<compile_context>
chip_gen: v7x
topology: tpu7x:2x2x1
jax: 0.10.0
libtpu: 0.0.40
codegen_flags: <defaults>
</compile_context>

<pallas_src>
import functools

import jax
import jax.numpy as jnp
from jax.experimental import pallas as pl
from jax.experimental.pallas import tpu as pltpu

NEG_INF = -2.0 * 10.0 ** 10  # matches self.neg_INF in the PyTorch module


def _round_up(x, m):
    return ((x + m - 1) // m) * m


def _code2vec_kernel(ctx_ref, starts_ref, w_ref, a_ref, wout_ref,
                     cv_ref, out_ref, *, bt, n):
    # ctx_ref:    (Bt*N, C) bf16 — concatenated [start | path | end] embeddings
    # starts_ref: (Bt, N, 1) int32 — start-token indices (mask source)
    # w_ref:      (C, E)  bf16 — linear weight, transposed (W.T)
    # a_ref:      (1, 1, E) f32 — attention vector
    # wout_ref:   (E, L)  f32 — output linear weight, transposed
    # cv_ref:     (Bt, E) f32
    # out_ref:    (Bt, L) f32
    e_dim = w_ref.shape[1]

    # One big MXU matmul over all Bt*N context rows, f32 accumulation.
    comb = jnp.tanh(
        jnp.dot(ctx_ref[...], w_ref[...],
                preferred_element_type=jnp.float32))          # (Bt*N, E)
    comb3 = comb.reshape(bt, n, e_dim)                         # (Bt, N, E)

    # Attention score: VPU multiply + lane reduce (no 1-column MXU matmul).
    lin = jnp.sum(comb3 * a_ref[...], axis=2, keepdims=True)   # (Bt, N, 1)

    # Mask computed in-kernel from the start indices.
    mask = (starts_ref[...] > 1).astype(jnp.float32)           # (Bt, N, 1)
    scores = lin * mask + (1.0 - mask) * NEG_INF

    # Masked softmax over the N (path) axis, per batch row.
    m = jnp.max(scores, axis=1, keepdims=True)                 # (Bt, 1, 1)
    e = jnp.exp(scores - m)
    denom = jnp.sum(e, axis=1, keepdims=True)                  # (Bt, 1, 1)
    attn = e * pl.reciprocal(denom, approx=False)              # (Bt, N, 1)

    # Attention-weighted code vectors, then one batched output projection.
    cv = jnp.sum(comb3 * attn, axis=1)                         # (Bt, E)
    cv_ref[...] = cv
    out_ref[...] = jnp.dot(cv, wout_ref[...],
                           preferred_element_type=jnp.float32)  # (Bt, L)


def code2vec_forward(starts, paths, ends, params):
    """starts/paths/ends: int32 [B, N]. Returns (code_vector [B,E], output [B,L])."""
    values_emb = params["values_embedding"]   # (Vv, Dv)
    paths_emb = params["paths_embedding"]     # (Vp, Dp)
    W = params["linear_w"]                    # (E, Dp + 2*Dv)
    a = params["a"]                           # (1, E)
    Wout = params["output_w"]                 # (L, E)

    B, N = starts.shape
    E = W.shape[0]
    L = Wout.shape[0]
    C = paths_emb.shape[1] + 2 * values_emb.shape[1]

    # Pad the path axis to a sublane multiple so the in-kernel (Bt*N, E) ->
    # (Bt, N, E) reshape is layout-preserving. Padded paths use index 0, which
    # fails the (starts > 1) mask and thus gets exactly zero attention weight.
    n_pad = _round_up(N, 8)

    # Batch tile: as many rows per grid step as a ~20 MiB (double-buffered)
    # budget allows — re-derived per shape so it also fits v7x's 64 MiB VMEM.
    bytes_per_row = (2 * (n_pad * C * 2)       # ctx block (bf16), double-buffered
                     + 2 * (n_pad * 4)         # starts block
                     + n_pad * E * 4           # comb intermediate
                     + 2 * (E + L) * 4)        # output slabs
    bt = max(8, min(512, (20 * 1024 * 1024) // max(bytes_per_row, 1)))
    bt = (bt // 8) * 8
    bt = min(bt, _round_up(B, 8))
    b_pad = _round_up(B, bt)
    # Prefer >= 2 grid steps so both v7x TensorCores get work.
    if b_pad // bt < 2 and b_pad >= 16:
        bt = _round_up(pl.cdiv(b_pad, 2), 8)
        b_pad = _round_up(B, bt)
    grid_b = b_pad // bt

    def pad_idx(x):
        return jnp.pad(x, ((0, b_pad - B), (0, n_pad - N)))

    starts_p = pad_idx(starts)
    paths_p = pad_idx(paths)
    ends_p = pad_idx(ends)

    # --- glue: embedding gathers + concat + bf16 cast (halves HBM bytes) ---
    ctx = jnp.concatenate(
        [values_emb[starts_p], paths_emb[paths_p], values_emb[ends_p]],
        axis=2).astype(jnp.bfloat16)                      # (B_pad, N_pad, C)
    ctx2d = ctx.reshape(b_pad * n_pad, C)                 # row per (batch, path)

    starts3 = starts_p.reshape(b_pad, n_pad, 1).astype(jnp.int32)

    wT = W.T.astype(jnp.bfloat16)                         # (C, E)
    a3 = a.reshape(1, 1, E).astype(jnp.float32)           # (1, 1, E)
    woutT = Wout.T.astype(jnp.float32)                    # (E, L)

    kernel = functools.partial(_code2vec_kernel, bt=bt, n=n_pad)

    cv, out = pl.pallas_call(
        kernel,
        out_shape=(
            jax.ShapeDtypeStruct((b_pad, E), jnp.float32),
            jax.ShapeDtypeStruct((b_pad, L), jnp.float32),
        ),
        grid_spec=pltpu.PrefetchScalarGridSpec(
            num_scalar_prefetch=0,
            grid=(grid_b,),
            in_specs=[
                pl.BlockSpec((bt * n_pad, C), lambda i: (i, 0)),
                pl.BlockSpec((bt, n_pad, 1), lambda i: (i, 0, 0)),
                pl.BlockSpec((C, E), lambda i: (0, 0)),
                pl.BlockSpec((1, 1, E), lambda i: (0, 0, 0)),
                pl.BlockSpec((E, L), lambda i: (0, 0)),
            ],
            out_specs=[
                pl.BlockSpec((bt, E), lambda i: (i, 0)),
                pl.BlockSpec((bt, L), lambda i: (i, 0)),
            ],
        ),
        compiler_params=pltpu.CompilerParams(
            dimension_semantics=("parallel",),
            vmem_limit_bytes=48 * 1024 * 1024),
    )(ctx2d, starts3, wT, a3, woutT)

    return cv[:B], out[:B]


def _reference_forward(starts, paths, ends, params):
    """Pure-JAX f32 reference mirroring the PyTorch forward (eval mode)."""
    values_emb = params["values_embedding"]
    paths_emb = params["paths_embedding"]
    W = params["linear_w"]
    a = params["a"]
    Wout = params["output_w"]

    ctx = jnp.concatenate(
        [values_emb[starts], paths_emb[paths], values_emb[ends]], axis=2)
    comb = jnp.tanh(ctx @ W.T)                              # (B, N, E)
    mask = (starts > 1).astype(jnp.float32)[..., None]      # (B, N, 1)
    lin = comb @ a.T                                        # (B, N, 1)
    scores = lin * mask + (1.0 - mask) * NEG_INF
    attn = jax.nn.softmax(scores, axis=1)
    cv = jnp.sum(comb * attn, axis=1)                       # (B, E)
    return cv, cv @ Wout.T


if __name__ == "__main__":
    # Small, forward-consistent shapes (exercise batch/path padding + 2 tiles).
    B, N = 10, 6
    val_dim = 32
    path_dim = 32
    emb_dim = 32
    labels_num = 16
    values_vocab = 50
    paths_vocab = 60
    C = path_dim + 2 * val_dim

    key = jax.random.PRNGKey(0)
    k1, k2, k3, k4, k5, k6, k7, k8 = jax.random.split(key, 8)

    params = {
        "values_embedding": jax.random.normal(k1, (values_vocab, val_dim), jnp.float32),
        "paths_embedding": jax.random.normal(k2, (paths_vocab, path_dim), jnp.float32),
        "linear_w": jax.random.normal(k3, (emb_dim, C), jnp.float32) * 0.05,
        "a": jax.random.normal(k4, (1, emb_dim), jnp.float32),
        "output_w": jax.random.normal(k5, (labels_num, emb_dim), jnp.float32) * 0.05,
    }

    starts = jax.random.randint(k6, (B, N), 0, values_vocab, dtype=jnp.int32)
    paths = jax.random.randint(k7, (B, N), 0, paths_vocab, dtype=jnp.int32)
    ends = jax.random.randint(k8, (B, N), 0, values_vocab, dtype=jnp.int32)

    code_vec, output = jax.jit(code2vec_forward)(starts, paths, ends, params)
    jax.block_until_ready((code_vec, output))

    ref_cv, ref_out = _reference_forward(starts, paths, ends, params)
    # Tolerance loosened vs f32 reference because the main matmul runs in bf16.
    assert jnp.allclose(code_vec, ref_cv, atol=5e-2, rtol=5e-2), "code_vector mismatch"
    assert jnp.allclose(output, ref_out, atol=5e-2, rtol=5e-2), "output mismatch"

    print("KERNEL_OK")
</pallas_src>

<mosaic_0001>
module attributes {stable_mosaic.version = 11 : i64} {
  func.func @_code2vec_kernel(%arg0: i32, %arg1: memref<64x96xbf16, #tpu.memory_space<vmem>>, %arg2: memref<8x8x1xi32, #tpu.memory_space<vmem>>, %arg3: memref<96x32xbf16, #tpu.memory_space<vmem>>, %arg4: memref<1x1x32xf32, #tpu.memory_space<vmem>>, %arg5: memref<32x16xf32, #tpu.memory_space<vmem>>, %arg6: memref<8x32xf32, #tpu.memory_space<vmem>>, %arg7: memref<8x16xf32, #tpu.memory_space<vmem>>) attributes {dimension_semantics = [#tpu.dimension_semantics<parallel>], iteration_bounds = array<i64: 2>, scalar_prefetch = 0 : i64, scratch_operands = 0 : i64, tpu.core_type = #tpu.core_type<tc>, window_params = [{transform_indices = @transform_0, window_bounds = array<i64: 64, 96>}, {transform_indices = @transform_1, window_bounds = array<i64: 8, 8, 1>}, {pipeline_mode = #tpu.pipeline_mode<synchronous>, transform_indices = @transform_2, window_bounds = array<i64: 96, 32>}, {pipeline_mode = #tpu.pipeline_mode<synchronous>, transform_indices = @transform_3, window_bounds = array<i64: 1, 1, 32>}, {pipeline_mode = #tpu.pipeline_mode<synchronous>, transform_indices = @transform_4, window_bounds = array<i64: 32, 16>}, {transform_indices = @transform_5, window_bounds = array<i64: 8, 32>}, {transform_indices = @transform_6, window_bounds = array<i64: 8, 16>}]} {
    %c0 = arith.constant 0 : index
    %c0_0 = arith.constant 0 : index
    %0 = vector.load %arg1[%c0, %c0_0] : memref<64x96xbf16, #tpu.memory_space<vmem>>, vector<64x96xbf16>
    %c0_1 = arith.constant 0 : index
    %c0_2 = arith.constant 0 : index
    %1 = vector.load %arg3[%c0_1, %c0_2] : memref<96x32xbf16, #tpu.memory_space<vmem>>, vector<96x32xbf16>
    %cst = arith.constant dense<0.000000e+00> : vector<64x32xf32>
    %2 = tpu.matmul %0, %1, %cst {dimension_numbers = #tpu.dot_dimension_numbers<[1], [0], [0], [1], [0, 0, 1, 1], [], []>} : vector<64x96xbf16>, vector<96x32xbf16>, vector<64x32xf32> -> vector<64x32xf32>
    %3 = math.tanh %2 : vector<64x32xf32>
    %4 = vector.shape_cast %3 : vector<64x32xf32> to vector<8x8x32xf32>
    %c0_3 = arith.constant 0 : index
    %c0_4 = arith.constant 0 : index
    %c0_5 = arith.constant 0 : index
    %5 = vector.load %arg4[%c0_3, %c0_4, %c0_5] : memref<1x1x32xf32, #tpu.memory_space<vmem>>, vector<1x1x32xf32>
    %6 = vector.broadcast %5 : vector<1x1x32xf32> to vector<8x8x32xf32>
    %7 = arith.mulf %4, %6 : vector<8x8x32xf32>
    %cst_6 = arith.constant dense<0.000000e+00> : vector<8x8xf32>
    %8 = vector.multi_reduction <add>, %7, %cst_6 [2] : vector<8x8x32xf32> to vector<8x8xf32>
    %9 = vector.shape_cast %8 : vector<8x8xf32> to vector<8x8x1xf32>
    %c0_7 = arith.constant 0 : index
    %c0_8 = arith.constant 0 : index
    %c0_9 = arith.constant 0 : index
    %10 = vector.load %arg2[%c0_7, %c0_8, %c0_9] : memref<8x8x1xi32, #tpu.memory_space<vmem>>, vector<8x8x1xi32>
    %c1_i32 = arith.constant 1 : i32
    %11 = vector.broadcast %c1_i32 : i32 to vector<8x8x1xi32>
    %12 = arith.cmpi sgt, %10, %11 : vector<8x8x1xi32>
    %13 = arith.extui %12 : vector<8x8x1xi1> to vector<8x8x1xi32>
    %14 = arith.sitofp %13 : vector<8x8x1xi32> to vector<8x8x1xf32>
    %15 = arith.mulf %9, %14 : vector<8x8x1xf32>
    %cst_10 = arith.constant 1.000000e+00 : f32
    %16 = vector.broadcast %cst_10 : f32 to vector<8x8x1xf32>
    %17 = arith.subf %16, %14 : vector<8x8x1xf32>
    %cst_11 = arith.constant -2.000000e+10 : f32
    %18 = vector.broadcast %cst_11 : f32 to vector<8x8x1xf32>
    %19 = arith.mulf %17, %18 : vector<8x8x1xf32>
    %20 = arith.addf %15, %19 : vector<8x8x1xf32>
    %cst_12 = arith.constant dense<0xFF800000> : vector<8x1xf32>
    %21 = vector.multi_reduction <maximumf>, %20, %cst_12 [1] : vector<8x8x1xf32> to vector<8x1xf32>
    %22 = vector.shape_cast %21 : vector<8x1xf32> to vector<8x1x1xf32>
    %23 = vector.broadcast %22 : vector<8x1x1xf32> to vector<8x8x1xf32>
    %24 = arith.subf %20, %23 : vector<8x8x1xf32>
    %25 = math.exp %24 : vector<8x8x1xf32>
    %cst_13 = arith.constant dense<0.000000e+00> : vector<8x1xf32>
    %26 = vector.multi_reduction <add>, %25, %cst_13 [1] : vector<8x8x1xf32> to vector<8x1xf32>
    %27 = vector.shape_cast %26 : vector<8x1xf32> to vector<8x1x1xf32>
    %28 = tpu.reciprocal %27 : vector<8x1x1xf32> -> vector<8x1x1xf32>
    %29 = vector.broadcast %28 : vector<8x1x1xf32> to vector<8x8x1xf32>
    %30 = arith.mulf %25, %29 : vector<8x8x1xf32>
    %31 = vector.broadcast %30 : vector<8x8x1xf32> to vector<8x8x32xf32>
    %32 = arith.mulf %4, %31 : vector<8x8x32xf32>
    %cst_14 = arith.constant dense<0.000000e+00> : vector<8x32xf32>
    %33 = vector.multi_reduction <add>, %32, %cst_14 [1] : vector<8x8x32xf32> to vector<8x32xf32>
    %c0_15 = arith.constant 0 : index
    %c0_16 = arith.constant 0 : index
    %34 = vector.load %arg6[%c0_15, %c0_16] : memref<8x32xf32, #tpu.memory_space<vmem>>, vector<8x32xf32>
    tpu.vector_store %arg6[%c0_15, %c0_16], %33 {strides = array<i32>} : memref<8x32xf32, #tpu.memory_space<vmem>>, vector<8x32xf32>,
    %c0_17 = arith.constant 0 : index
    %c0_18 = arith.constant 0 : index
    %35 = vector.load %arg5[%c0_17, %c0_18] : memref<32x16xf32, #tpu.memory_space<vmem>>, vector<32x16xf32>
    %cst_19 = arith.constant dense<0.000000e+00> : vector<8x16xf32>
    %36 = tpu.matmul %33, %35, %cst_19 {dimension_numbers = #tpu.dot_dimension_numbers<[1], [0], [0], [1], [0, 0, 1, 1], [], []>} : vector<8x32xf32>, vector<32x16xf32>, vector<8x16xf32> -> vector<8x16xf32>
    %c0_20 = arith.constant 0 : index
    %c0_21 = arith.constant 0 : index
    %37 = vector.load %arg7[%c0_20, %c0_21] : memref<8x16xf32, #tpu.memory_space<vmem>>, vector<8x16xf32>
    tpu.vector_store %arg7[%c0_20, %c0_21], %36 {strides = array<i32>} : memref<8x16xf32, #tpu.memory_space<vmem>>, vector<8x16xf32>,
    return
  }
  func.func @transform_0(%arg0: i32) -> (i32, i32) {
    %c0_i32 = arith.constant 0 : i32
    %c0_i32_0 = arith.constant 0 : i32
    return %arg0, %c0_i32 : i32, i32
  }
  func.func @transform_1(%arg0: i32) -> (i32, i32, i32) {
    %c0_i32 = arith.constant 0 : i32
    %c0_i32_0 = arith.constant 0 : i32
    %c0_i32_1 = arith.constant 0 : i32
    return %arg0, %c0_i32, %c0_i32_0 : i32, i32, i32
  }
  func.func @transform_2(%arg0: i32) -> (i32, i32) {
    %c0_i32 = arith.constant 0 : i32
    %c0_i32_0 = arith.constant 0 : i32
    %c0_i32_1 = arith.constant 0 : i32
    return %c0_i32, %c0_i32_0 : i32, i32
  }
  func.func @transform_3(%arg0: i32) -> (i32, i32, i32) {
    %c0_i32 = arith.constant 0 : i32
    %c0_i32_0 = arith.constant 0 : i32
    %c0_i32_1 = arith.constant 0 : i32
    %c0_i32_2 = arith.constant 0 : i32
    return %c0_i32, %c0_i32_0, %c0_i32_1 : i32, i32, i32
  }
  func.func @transform_4(%arg0: i32) -> (i32, i32) {
    %c0_i32 = arith.constant 0 : i32
    %c0_i32_0 = arith.constant 0 : i32
    %c0_i32_1 = arith.constant 0 : i32
    return %c0_i32, %c0_i32_0 : i32, i32
  }
  func.func @transform_5(%arg0: i32) -> (i32, i32) {
    %c0_i32 = arith.constant 0 : i32
    %c0_i32_0 = arith.constant 0 : i32
    return %arg0, %c0_i32 : i32, i32
  }
  func.func @transform_6(%arg0: i32) -> (i32, i32) {
    %c0_i32 = arith.constant 0 : i32
    %c0_i32_0 = arith.constant 0 : i32
    return %arg0, %c0_i32 : i32, i32
  }
}

</mosaic_0001>

<bundles_post_ra>
// kernel: code2vec_forward.1
= control target key start
LH: loop header
LB: loop body
LE: loop exit
PB: predicated region body
PF: predicated region fallthrough
CT: control target
= control target key end

     0   :  { %12 = vsyncpa [#allocation3], 0  ;;  %s1688_s0 = inlined_call_operand.vmem [shape: bf16[128,96], index: 0, kind: input, shape index: {}]   ;;  %s1689_s1 = inlined_call_operand.vmem [shape: s32[16,8,1], index: 1, kind: input, shape index: {}]   ;;  %s1690_s2 = inlined_call_operand.vmem [shape: bf16[96,32], index: 2, kind: input, shape index: {}]   ;;  %s1691_s3 = inlined_call_operand.vmem [shape: f32[1,1,32], index: 3, kind: input, shape index: {}]   ;;  %s1692_s4 = inlined_call_operand.vmem [shape: f32[32,16], index: 4, kind: input, shape index: {}]   ;;  %s1693_s5 = inlined_call_operand.hbm [shape: f32[16,32], index: 5, kind: output, shape index: {0}]   ;;  %s1694_s6 = inlined_call_operand.hbm [shape: f32[16,16], index: 6, kind: output, shape index: {1}]  }
   0x1   :  { %14 = vsyncpa [#allocation3 + $0x1], 0 }
   0x2   :  { %15 = vsyncpa [#allocation5], 0 }
   0x3   :  { %17 = vsyncpa [#allocation5 + $0x1], 0  ;;  %s1395_s21 = smov 0   ;;  %s1397_s22 = smov 0  }
   0x4   :  { %s1399_s23 = smov 0   ;;  %s1401_s24 = smov 0  }
   0x5 LB: > { %s1416_s25 = sadd.s32 4294967295, %s1352_s24   ;;  %s1046_s26 = sadd.s32 4294967294, %s1352_s24   ;;  %s1352_s24 = sphi %s1401_s24, %s1700_s24   ;;  %s1348_s23 = sphi %s1399_s23, %s1699_s23   ;;  %s1344_s22 = sphi %s1397_s22, %s1698_s22   ;;  %s1340_s21 = sphi %s1395_s21, %s1697_s21  }
   0x6   : > { %s1420_s27 = sadd.s32 1, %s1352_s24   ;;  %s145_s28 = sadd.s32 1, %s1348_s23 }
   0x7   : > { %s142_s29 = ssub.s32 %s1352_s24, %s1420_s27  ;;  %p155_p0 = scmp.ne.s32.totalorder %s1348_s23, %s1344_s22 }
   0x8   : > { %p143_p1 = scmp.eq.s32.totalorder %s142_s29, 0  ;;  %p156_p2 = scmp.eq.s32.totalorder %s1416_s25, 1 }
   0x9   : > { %p161_p3 = scmp.ne.s32.totalorder %s1344_s22, %s1340_s21  ;;  %p162_p4 = scmp.eq.s32.totalorder %s1046_s26, 1 }
   0xa   : > { %s1431_s30 = scalar_select %p143_p1, %s1348_s23, %s145_s28  }
   0xb   : > { %p1433_p5 = por %p156_p2, %p155_p0  ;;  %p1437_p6 = por %p162_p4, %p161_p3 }
   0xc   : > { %p1049_p7 = scmp.ge.s32.totalorder %s1352_s24, 1  ;;  %p233_p8 = scmp.lt.s32.totalorder %s1352_s24, 3 }
   0xe   : > { %p234_p9 = pnand %p1049_p7, %p233_p8 }
   0xf   : > { %v1200_v0 = vld [vmem:[%s1690_s2] sm:$0xff] (!%p234_p9)   ;;  %s1052_s11 = sshll.u32 (!%p234_p9), %s1416_s25, 3  ;;  %v1201_v1 = vld [vmem:[%s1690_s2 + $0x8] sm:$0xff] (!%p234_p9)   ;;  %v1202_v2 = vld [vmem:[%s1690_s2 + $0x10] sm:$0xff] (!%p234_p9)   ;;  %vm362_vm0 = vcmask (!%p234_p9), 785408   ;;  %vm463_vm1 = vcmask (!%p234_p9), 261120  }
  0x10   : > { %237 = sbr.rel (%p234_p9) target bundleno = 873 (0x369), region = 40  ;;  %p274_p10 = scmp.lt.s32.totalorder (!%p234_p9), %s1052_s11, 15  ;;  %1101 = vmatprep.subr.bf16.mxu0 (!%p234_p9), %v1200_v0  ;;  %1138 = vmatprep.subr.bf16.mxu1 (!%p234_p9), %v1200_v0  ;;  %v1203_v4 = vld [vmem:[%s1690_s2 + $0x18] sm:$0xff] (!%p234_p9)   ;;  %v1204_v6 = vld [vmem:[%s1690_s2 + $0x20] sm:$0xff] (!%p234_p9)   ;;  %v1205_v7 = vld [vmem:[%s1690_s2 + $0x28] sm:$0xff] (!%p234_p9)   ;;  %v1354_v43 = vmov (!%p234_p9), 0  }
  0x11   : > { %1102 = vmatpush3.bf16.msra.mxu0 (!%p234_p9), %v1200_v0  ;;  %1144 = vmatpush3.bf16.msra.mxu1 (!%p234_p9), %v1200_v0  ;;  %v1070_v18 = vld [vmem:[%s1691_s3] ss:$0 sm:$0xff] (!%p234_p9)  ;;  %v1355_v48 = vmov (!%p234_p9), 0.0   ;;  %vm552_vm9 = vcmask (!%p234_p9), 7168   ;;  %vm1357_vm11 = vmmov (!%p234_p9), 0   ;;  %vm817_vm12 = vcmask (!%p234_p9), 1041409  }
  0x12   : > { %1103 = vmatprep.subr.bf16.mxu0 (!%p234_p9), %v1201_v1  ;;  %1139 = vmatprep.subr.bf16.mxu1 (!%p234_p9), %v1201_v1  ;;  %vm819_vm13 = vcmask (!%p234_p9), 1042434   ;;  %vm821_vm14 = vcmask (!%p234_p9), 1043459   ;;  %vm823_vm15 = vcmask (!%p234_p9), 1044484   ;;  %s1605_s10 = sand.u32 (!%p234_p9), 1, %s1344_s22   ;;  %s1358_s20 = smov (!%p234_p9), [#allocation2]  }
  0x13   : > { %1199 = vset.pattern.permute.xlu1 (!%p234_p9), %v1354_v43  ;;  %1198 = vset.pattern.permute.xlu0 (!%p234_p9), %v1354_v43  ;;  %s1050_s12 = sshll.u32 (!%p234_p9), %s1605_s10, 3  ;;  %s912_s18 = scalar_lea.sflag (!%p234_p9), [#allocation3], %s1605_s10 }
  0x14   : > { %s265_s13 = scalar_lea.vmem (!%p234_p9), [#allocation2], %s1050_s12  ;;  %s1262_s26 = sshll.u32 (!%p234_p9), %s1358_s20, 4  ;;  %s1263_s26 = int_to_ptr.vmem [resolvable:$false] %s1262_s26 }
  0x15   : > { %1104 = vmatpush3.bf16.msra.mxu0 (!%p234_p9), %v1201_v1  ;;  %1145 = vmatpush3.bf16.msra.mxu1 (!%p234_p9), %v1201_v1  ;;  %s930_s15 = sshll.u32 (!%p234_p9), %s265_s13, 4  ;;  %s1264_s28 = scalar_lea.vmem (!%p234_p9), %s1263_s26, 256  ;;  %s931_s15 = int_to_ptr.vmem [resolvable:$true] %s930_s15 }
  0x16   : > { %1105 = vmatprep.subr.bf16.mxu0 (!%p234_p9), %v1202_v2  ;;  %1140 = vmatprep.subr.bf16.mxu1 (!%p234_p9), %v1202_v2  ;;  %p1265_p0 = scmp.lt.s32.totalorder (!%p234_p9), %s931_s15, %s1263_s26 }
  0x17   : > { %s1702_s11 = smov (!%p274_p10, %s1052_s11), 15 }
  0x18   : > { %s1053_s16 = sshll.u32 %s1702_s11, 2  ;;  %s1055_s14 = sshll.u32 %s1702_s11, 3 }
  0x19   : > { %s277_s19 = scalar_lea.vmem %s1688_s0, %s1053_s16  ;;  %1106 = vmatpush3.bf16.msra.mxu0 %v1202_v2  ;;  %1146 = vmatpush3.bf16.msra.mxu1 %v1202_v2  ;;  %s283_s17 = scalar_lea.vmem %s1689_s1, %s1055_s14 }
  0x1a   : > { %v1206_v3 = vld [vmem:[%s277_s19] sm:$0xff]   ;;  %v1208_v5 = vld [vmem:[%s277_s19 + $0x10] sm:$0xff]   ;;  %1107 = vmatprep.subr.bf16.mxu0 %v1203_v4  ;;  %1141 = vmatprep.subr.bf16.mxu1 %v1203_v4  ;;  %v1207_v8 = vld [vmem:[%s277_s19 + $0x8] sm:$0xff]   ;;  %s1082_s14 = sshll.u32 %s1416_s25, 7 }
  0x1b   : > { %1113 = vmatprep.mubr.msk.bf16.mxu0 %vm362_vm0, %v1206_v3  ;;  %1117 = vmatprep.mubr.msk.bf16.mxu1 %vm362_vm0, %v1208_v5  ;;  %v1209_v9 = vld [vmem:[%s277_s19 + $0x18] sm:$0xff]   ;;  %v490_v44 = vld [vmem:[%s283_s17 + $0x10] sm:$0xff]  ;;  %v488_v45 = vld [vmem:[%s283_s17] sm:$0xff]  ;;  %s1618_s11 = scalar_lea.hbm %s1693_s5, %s1082_s14  ;;  %s1258_s19 = scalar_lea.vmem %s931_s15, 128 }
  0x1c   : > { %vm498_vm2 = vcmp.gt.s32.totalorder %v490_v44, 1  ;;  %vm496_vm3 = vcmp.gt.s32.totalorder %v488_v45, 1  ;;  %v491_v46 = vld [vmem:[%s283_s17 + $0x18] sm:$0xff]  ;;  %v489_v47 = vld [vmem:[%s283_s17 + $0x8] sm:$0xff]  ;;  %v492_v53 = vld [vmem:[%s283_s17 + $0x20] sm:$0xff]  ;;  %p1259_p11 = scmp.ne.s32.totalorder %s931_s15, %s1258_s19  ;;  %p1266_p1 = scmp.lt.s32.totalorder %s1264_s28, %s1258_s19 }
  0x1d   : > { %1108 = vmatpush3.bf16.msra.mxu0 %v1203_v4  ;;  %1147 = vmatpush3.bf16.msra.mxu1 %v1203_v4  ;;  %v1073_v49 = vsel %vm498_vm2, 1.0, %v1355_v48  ;;  %v1071_v50 = vsel %vm496_vm3, 1.0, %v1355_v48  ;;  %vm499_vm4 = vcmp.gt.s32.totalorder %v491_v46, 1  ;;  %vm497_vm5 = vcmp.gt.s32.totalorder %v489_v47, 1  ;;  %v493_v51 = vld [vmem:[%s283_s17 + $0x28] sm:$0xff]  ;;  %v495_v57 = vld [vmem:[%s283_s17 + $0x38] sm:$0xff] }
  0x1e   : > { %1109 = vmatprep.subr.bf16.mxu0 %v1204_v6  ;;  %1142 = vmatprep.subr.bf16.mxu1 %v1204_v6  ;;  %v530_v52 = vsub.f32 1.0, %v1073_v49  ;;  %v528_v54 = vsub.f32 1.0, %v1071_v50  ;;  %v1074_v55 = vsel %vm499_vm4, 1.0, %v1355_v48  ;;  %v1072_v56 = vsel %vm497_vm5, 1.0, %v1355_v48  ;;  %v494_v60 = vld [vmem:[%s283_s17 + $0x30] sm:$0xff]  ;;  %p1260_p12 = pnand %p1259_p11, %p1433_p5  ;;  %p1267_p2 = por %p1266_p1, %p1265_p0 }
  0x1f   : > { %vm501_vm6 = vcmp.gt.s32.totalorder %v493_v51, 1  ;;  %vm500_vm7 = vcmp.gt.s32.totalorder %v492_v53, 1  ;;  %v531_v59 = vsub.f32 1.0, %v1074_v55  ;;  %v529_v63 = vsub.f32 1.0, %v1072_v56 }
  0x20   : > { %v538_v58 = vmul.f32 -2e+10, %v530_v52  ;;  %v536_v62 = vmul.f32 -2e+10, %v528_v54  ;;  %v1076_v0 = vsel %vm501_vm6, 1.0, %v1355_v48  ;;  %v1075_v3 = vsel %vm500_vm7, 1.0, %v1355_v48  ;;  %p1261_p13 = pneg %p1260_p12 }
  0x21   : > { %1110 = vmatpush3.bf16.msra.mxu0 %v1204_v6  ;;  %1148 = vmatpush3.bf16.msra.mxu1 %v1204_v6  ;;  %vm503_vm8 = vcmp.gt.s32.totalorder %v495_v57, 1  ;;  %vm502_vm10 = vcmp.gt.s32.totalorder %v494_v60, 1  ;;  %v539_v6 = vmul.f32 -2e+10, %v531_v59  ;;  %vm827_vm2 = vcmask 1046534  }
  0x22   : > { %1111 = vmatprep.subr.bf16.mxu0 %v1205_v7  ;;  %1143 = vmatprep.subr.bf16.mxu1 %v1205_v7  ;;  %vm829_vm3 = vcmask 1047559   ;;  %p1268_p3 = pnand %p1267_p2, %p1261_p13 }
  0x25   : > { %1112 = vmatpush3.bf16.msra.mxu0 %v1205_v7  ;;  %1149 = vmatpush3.bf16.msra.mxu1 %v1205_v7  ;;  %v533_v7 = vsub.f32 1.0, %v1076_v0 }
  0x28   : > { %1114 = vmatmul.mubr.msk.bf16.vlgmr.msra.gmra.mrb[0].mxu0 %vm362_vm0, %v1207_v8  ;;  %1118 = vmatmul.mubr.msk.bf16.vlgmr.msra.gmra.mrb[0].mxu1 %vm362_vm0, %v1209_v9  ;;  %vm825_vm0 = vcmask 1045509  }
  0x29   : > { %1129 = vmatprep.mubr.msk.f32.mxu1 %vm1357_vm11, %v1355_v48 }
  0xfb   : > { %v1115_v10 = vpop.f32.mrb[0].mxu0  ;;  %v1119_v11 = vpop.f32.mrb[0].mxu1 }
  0xfc   : > { %1210 = vtanh.f32 %v1115_v10  ;;  %v409_v12 = vpop.f32.mrb[1].mxu0  ;;  %v425_v13 = vpop.f32.mrb[1].mxu1  ;;  %v537_v10 = vmul.f32 -2e+10, %v529_v63 }
  0xfd   : > { %1212 = vtanh.f32 %v409_v12  ;;  %v1116_v14 = vpop.f32.mrb[2].mxu0  ;;  %v1120_v15 = vpop.f32.mrb[2].mxu1  ;;  %v1078_v12 = vsel %vm503_vm8, 1.0, %v1355_v48 }
  0xfe   : > { %1214 = vtanh.f32 %v1116_v14  ;;  %v412_v16 = vpop.f32.mrb[3].mxu0  ;;  %v428_v17 = vpop.f32.mrb[3].mxu1 }
  0xff   : > { %1216 = vtanh.f32 %v412_v16  ;;  %v1077_v16 = vsel %vm502_vm10, 1.0, %v1355_v48 }
 0x100   : > { %1218 = vtanh.f32 %v425_v13 }
 0x101   : > { %1220 = vtanh.f32 %v428_v17 }
 0x102   : > { %1222 = vtanh.f32 %v1120_v15 }
 0x103   : > { %1224 = vtanh.f32 %v1119_v11  ;;  %v532_v11 = vsub.f32 1.0, %v1075_v3 }
 0x106   : > { %v1475_v19 = vpop.eup %1210 }
 0x107   : > { %v1477_v20 = vpop.eup %1212  ;;  %v457_v21 = vmul.f32 %v1475_v19, %v1070_v18 }
 0x108   : > { %v1480_v22 = vpop.eup %1214  ;;  %v455_v23 = vmul.f32 %v1477_v20, %v1070_v18 }
 0x109   : > { %v1483_v24 = vpop.eup %1216  ;;  %v470_v25 = vsel %vm463_vm1, %v457_v21, 0.0  ;;  %v458_v26 = vmul.f32 %v1480_v22, %v1070_v18 }
 0x10a   : > { %471 = vadd.xlane.f32.xlu1 %v470_v25  ;;  %v464_v27 = vsel %vm463_vm1, %v455_v23, 0.0  ;;  %v456_v28 = vmul.f32 %v1483_v24, %v1070_v18  ;;  %v1489_v29 = vpop.eup %1218 }
 0x10b   : > { %465 = vadd.xlane.f32.xlu0 %v464_v27  ;;  %v459_v30 = vmul.f32 %v1489_v29, %v1070_v18  ;;  %v1492_v31 = vpop.eup %1220  ;;  %v473_v32 = vsel %vm463_vm1, %v458_v26, 0.0  ;;  %v541_v26 = vmul.f32 -2e+10, %v533_v7  ;;  %v535_v27 = vsub.f32 1.0, %v1078_v12 }
 0x10c   : > { %v1495_v33 = vpop.eup %1222  ;;  %v467_v34 = vsel %vm463_vm1, %v456_v28, 0.0  ;;  %v460_v35 = vmul.f32 %v1492_v31, %v1070_v18 }
 0x10d   : > { %v1499_v36 = vpop.eup %1224  ;;  %v476_v38 = vsel %vm463_vm1, %v459_v30, 0.0  ;;  %v462_v39 = vmul.f32 %v1495_v33, %v1070_v18 }
 0x10e   : > { %474 = vadd.xlane.f32.xlu1 %v473_v32  ;;  %v479_v37 = vsel %vm463_vm1, %v460_v35, 0.0  ;;  %v461_v40 = vmul.f32 %v1499_v36, %v1070_v18  ;;  %v534_v35 = vsub.f32 1.0, %v1077_v16 }
 0x10f   : > { %468 = vadd.xlane.f32.xlu0 %v467_v34  ;;  %v485_v41 = vsel %vm463_vm1, %v462_v39, 0.0  ;;  %v540_v34 = vmul.f32 -2e+10, %v532_v11 }
 0x110   : > { %v482_v42 = vsel %vm463_vm1, %v461_v40, 0.0  ;;  %v542_v54 = vmul.f32 -2e+10, %v534_v35 }
 0x112   : > { %480 = vadd.xlane.f32.xlu1 %v479_v37 }
 0x113   : > { %477 = vadd.xlane.f32.xlu0 %v476_v38 }
 0x116   : > { %486 = vadd.xlane.f32.xlu1 %v485_v41 }
 0x117   : > { %483 = vadd.xlane.f32.xlu0 %v482_v42 }
 0x197   : > { %v472_v61 = vpop.xlane.xlu1 %471 }
 0x198   : > { %v522_v1 = vmul.f32 %v1073_v49, %v472_v61  ;;  %v466_v2 = vpop.xlane.xlu0 %465  ;;  %v543_v49 = vmul.f32 -2e+10, %v535_v27 }
 0x199   : > { %v520_v4 = vmul.f32 %v1071_v50, %v466_v2 }
 0x19a   : > { %v1517_v5 = vadd.f32 %v538_v58, %v522_v1 }
 0x19b   : > { %v1519_v8 = vadd.f32 %v536_v62, %v520_v4  ;;  %v475_v9 = vpop.xlane.xlu1 %474 }
 0x19c   : > { %v567_v13 = vsel %vm552_vm9, %v1517_v5, -inf  ;;  %v523_v14 = vmul.f32 %v1074_v55, %v475_v9  ;;  %v469_v15 = vpop.xlane.xlu0 %468 }
 0x19d   : > { %v568_v17 = vrot.slane %v567_v13, 4  ;;  %v553_v18 = vsel %vm552_vm9, %v1519_v8, -inf  ;;  %v521_v21 = vmul.f32 %v1072_v56, %v469_v15 }
 0x19e   : > { %v554_v23 = vrot.slane %v553_v18, 4  ;;  %v1527_v25 = vadd.f32 %v539_v6, %v523_v14 }
 0x19f   : > { %v569_v28 = vmax.f32 %v567_v13, %v568_v17  ;;  %v1529_v30 = vadd.f32 %v537_v10, %v521_v21  ;;  %v481_v32 = vpop.xlane.xlu1 %480 }
 0x1a0   : > { %v555_v37 = vmax.f32 %v553_v18, %v554_v23  ;;  %v574_v38 = vsel %vm552_vm9, %v1527_v25, -inf  ;;  %v525_v39 = vmul.f32 %v1076_v0, %v481_v32  ;;  %v478_v40 = vpop.xlane.xlu0 %477 }
 0x1a1   : > { %v570_v41 = vrot.slane %v569_v28, 2  ;;  %v575_v42 = vrot.slane %v574_v38, 4  ;;  %v560_v43 = vsel %vm552_vm9, %v1529_v30, -inf  ;;  %v524_v44 = vmul.f32 %v1075_v3, %v478_v40 }
 0x1a2   : > { %v556_v45 = vrot.slane %v555_v37, 2  ;;  %v561_v46 = vrot.slane %v560_v43, 4  ;;  %v1535_v47 = vadd.f32 %v541_v26, %v525_v39 }
 0x1a3   : > { %v571_v50 = vmax.f32 %v569_v28, %v570_v41  ;;  %v576_v51 = vmax.f32 %v574_v38, %v575_v42  ;;  %v548_v52 = vadd.f32 %v540_v34, %v524_v44  ;;  %v487_v53 = vpop.xlane.xlu1 %486 }
 0x1a4   : > { %v557_v55 = vmax.f32 %v555_v37, %v556_v45  ;;  %v562_v56 = vmax.f32 %v560_v43, %v561_v46  ;;  %v588_v57 = vsel %vm552_vm9, %v1535_v47, -inf  ;;  %v527_v58 = vmul.f32 %v1078_v12, %v487_v53  ;;  %v484_v59 = vpop.xlane.xlu0 %483 }
 0x1a5   : > { %v572_v60 = vrot.slane %v571_v50, 1  ;;  %v577_v61 = vrot.slane %v576_v51, 2  ;;  %v589_v62 = vrot.slane %v588_v57, 4  ;;  %v581_v63 = vsel %vm552_vm9, %v548_v52, -inf }
 0x1a6   : > { %v558_v0 = vrot.slane %v557_v55, 1  ;;  %v563_v1 = vrot.slane %v562_v56, 2  ;;  %v582_v2 = vrot.slane %v581_v63, 4  ;;  %v1540_v3 = vadd.f32 %v543_v49, %v527_v58 }
 0x1a7   : > { %v573_v4 = vmax.f32 %v571_v50, %v572_v60  ;;  %v578_v6 = vmax.f32 %v576_v51, %v577_v61  ;;  %v590_v7 = vmax.f32 %v588_v57, %v589_v62  ;;  %v526_v9 = vmul.f32 %v1077_v16, %v484_v59 }
 0x1a8   : > { %v559_v10 = vmax.f32 %v557_v55, %v558_v0  ;;  %v564_v11 = vmax.f32 %v562_v56, %v563_v1  ;;  %v583_v13 = vmax.f32 %v581_v63, %v582_v2  ;;  %v602_v12 = vsel %vm552_vm9, %v1540_v3, -inf }
 0x1a9   : > { %v611_v14 = vsub.f32 %v1517_v5, %v573_v4  ;;  %v579_v15 = vrot.slane %v578_v6, 1  ;;  %v591_v17 = vrot.slane %v590_v7, 2  ;;  %v603_v18 = vrot.slane %v602_v12, 4 }
 0x1aa   : > { %v609_v21 = vsub.f32 %v1519_v8, %v559_v10  ;;  %v565_v23 = vrot.slane %v564_v11, 1  ;;  %v584_v26 = vrot.slane %v583_v13, 2  ;;  %v550_v27 = vadd.f32 %v542_v54, %v526_v9 }
 0x1ab   : > { %v621_v28 = vmul.f32 1.442695, %v611_v14  ;;  %v580_v32 = vmax.f32 %v578_v6, %v579_v15  ;;  %v592_v34 = vmax.f32 %v590_v7, %v591_v17  ;;  %v604_v16 = vmax.f32 %v602_v12, %v603_v18 }
 0x1ac   : > { %v617_v35 = vmul.f32 1.442695, %v609_v21  ;;  %v566_v37 = vmax.f32 %v564_v11, %v565_v23  ;;  %v585_v38 = vmax.f32 %v583_v13, %v584_v26  ;;  %v595_v39 = vsel %vm552_vm9, %v550_v27, -inf }
 0x1ad   : > { %1226 = vpow2.f32 %v621_v28  ;;  %v612_v5 = vsub.f32 %v1527_v25, %v580_v32  ;;  %v593_v40 = vrot.slane %v592_v34, 1  ;;  %v605_v41 = vrot.slane %v604_v16, 2 }
 0x1ae   : > { %1228 = vpow2.f32 %v617_v35  ;;  %v586_v42 = vrot.slane %v585_v38, 1  ;;  %v596_v8 = vrot.slane %v595_v39, 4  ;;  %v610_v44 = vsub.f32 %v1529_v30, %v566_v37 }
 0x1af   : > { %v623_v43 = vmul.f32 1.442695, %v612_v5  ;;  %v594_v45 = vmax.f32 %v592_v34, %v593_v40  ;;  %v606_v46 = vmax.f32 %v604_v16, %v605_v41 }
 0x1b0   : > { %v587_v49 = vmax.f32 %v585_v38, %v586_v42  ;;  %v597_v50 = vmax.f32 %v595_v39, %v596_v8  ;;  %v619_v55 = vmul.f32 1.442695, %v610_v44 }
 0x1b1   : > { %v607_v51 = vrot.slane %v606_v46, 1  ;;  %1230 = vpow2.f32 %v623_v43  ;;  %v614_v56 = vsub.f32 %v1535_v47, %v594_v45 }
 0x1b2   : > { %v613_v53 = vsub.f32 %v548_v52, %v587_v49  ;;  %v598_v54 = vrot.slane %v597_v50, 2 }
 0x1b3   : > { %v608_v57 = vmax.f32 %v606_v46, %v607_v51  ;;  %v627_v61 = vmul.f32 1.442695, %v614_v56 }
 0x1b4   : > { %v625_v25 = vmul.f32 1.442695, %v613_v53  ;;  %v599_v58 = vmax.f32 %v597_v50, %v598_v54 }
 0x1b5   : > { %v616_v63 = vsub.f32 %v1540_v3, %v608_v57 }
 0x1b6   : > { %1232 = vpow2.f32 %v625_v25  ;;  %v600_v59 = vrot.slane %v599_v58, 1 }
 0x1b7   : > { %v1227_v60 = vpop.eup %1226  ;;  %1234 = vpow2.f32 %v619_v55  ;;  %v631_v7 = vmul.f32 1.442695, %v616_v63 }
 0x1b8   : > { %v1229_v30 = vpop.eup %1228  ;;  %v647_v62 = vsel %vm552_vm9, %v1227_v60, 0.0  ;;  %v601_v0 = vmax.f32 %v599_v58, %v600_v59  ;;  %1236 = vpow2.f32 %v627_v61 }
 0x1b9   : > { %v648_v52 = vrot.slane %v647_v62, 4  ;;  %v633_v1 = vsel %vm552_vm9, %v1229_v30, 0.0 }
 0x1ba   : > { %v634_v2 = vrot.slane %v633_v1, 4  ;;  %v615_v4 = vsub.f32 %v550_v27, %v601_v0 }
 0x1bb   : > { %v649_v47 = vadd.f32 %v648_v52, %v647_v62  ;;  %v1553_v10 = vpop.eup %1230 }
 0x1bc   : > { %v635_v6 = vadd.f32 %v634_v2, %v633_v1  ;;  %v629_v9 = vmul.f32 1.442695, %v615_v4  ;;  %v654_v3 = vsel %vm552_vm9, %v1553_v10, 0.0 }
 0x1bd   : > { %v650_v11 = vrot.slane %v649_v47, 2  ;;  %v655_v27 = vrot.slane %v654_v3, 4 }
 0x1be   : > { %1238 = vpow2.f32 %v629_v9  ;;  %v636_v13 = vrot.slane %v635_v6, 2 }
 0x1bf   : > { %v651_v12 = vadd.f32 %v650_v11, %v649_v47  ;;  %1240 = vpow2.f32 %v631_v7  ;;  %v656_v37 = vadd.f32 %v655_v27, %v654_v3 }
 0x1c0   : > { %v1555_v14 = vpop.eup %1232  ;;  %v637_v15 = vadd.f32 %v636_v13, %v635_v6 }
 0x1c1   : > { %v1559_v17 = vpop.eup %1234  ;;  %v661_v18 = vsel %vm552_vm9, %v1555_v14, 0.0  ;;  %v652_v21 = vrot.slane %v651_v12, 1  ;;  %v657_v45 = vrot.slane %v656_v37, 2 }
 0x1c2   : > { %v662_v23 = vrot.slane %v661_v18, 4  ;;  %v638_v26 = vrot.slane %v637_v15, 1  ;;  %v640_v32 = vsel %vm552_vm9, %v1559_v17, 0.0  ;;  %v1565_v35 = vpop.eup %1236 }
 0x1c3   : > { %v653_v28 = vadd.f32 %v652_v21, %v651_v12  ;;  %v641_v38 = vrot.slane %v640_v32, 4  ;;  %v668_v5 = vsel %vm552_vm9, %v1565_v35, 0.0  ;;  %v658_v55 = vadd.f32 %v657_v45, %v656_v37 }
 0x1c4   : > { %v663_v34 = vadd.f32 %v662_v23, %v661_v18  ;;  %v639_v16 = vadd.f32 %v638_v26, %v637_v15  ;;  %v669_v44 = vrot.slane %v668_v5, 4 }
 0x1c5   : > { %1242 = vrcp.f32 %v653_v28  ;;  %v642_v43 = vadd.f32 %v641_v38, %v640_v32  ;;  %v659_v0 = vrot.slane %v658_v55, 1 }
 0x1c6   : > { %1244 = vrcp.f32 %v639_v16  ;;  %v664_v40 = vrot.slane %v663_v34, 2  ;;  %v670_v54 = vadd.f32 %v669_v44, %v668_v5 }
 0x1c7   : > { %v643_v56 = vrot.slane %v642_v43, 2  ;;  %v660_v7 = vadd.f32 %v659_v0, %v658_v55 }
 0x1c8   : > { %v1239_v39 = vpop.eup %1238  ;;  %v665_v49 = vadd.f32 %v664_v40, %v663_v34  ;;  %v671_v47 = vrot.slane %v670_v54, 2  ;;  %v1356_v40 = vmov 0.0|0.0  }
 0x1c9   : > { %v675_v41 = vsel %vm552_vm9, %v1239_v39, 0.0  ;;  %v1241_v42 = vpop.eup %1240  ;;  %v644_v52 = vadd.f32 %v643_v56, %v642_v43  ;;  %1132 = vmatprep.subr.bf16.mxu1 %v1356_v40 }
 0x1ca   : > { %v676_v8 = vrot.slane %v675_v41, 4  ;;  %v682_v50 = vsel %vm552_vm9, %v1241_v42, 0.0  ;;  %v666_v61 = vrot.slane %v665_v49, 1  ;;  %v672_v9 = vadd.f32 %v671_v47, %v670_v54 }
 0x1cb   : > { %v683_v57 = vrot.slane %v682_v50, 4  ;;  %v645_v6 = vrot.slane %v644_v52, 1 }
 0x1cc   : > { %v677_v46 = vadd.f32 %v676_v8, %v675_v41  ;;  %v667_v4 = vadd.f32 %v666_v61, %v665_v49  ;;  %v673_v13 = vrot.slane %v672_v9, 1 }
 0x1cd   : > { %v684_v1 = vadd.f32 %v683_v57, %v682_v50 }
 0x1ce   : > { %v678_v51 = vrot.slane %v677_v46, 2  ;;  %v674_v3 = vadd.f32 %v673_v13, %v672_v9 }
 0x1cf   : > { %v1243_v53 = vpop.eup %1242  ;;  %v685_v11 = vrot.slane %v684_v1, 2 }
 0x1d0   : > { %v1245_v25 = vpop.eup %1244  ;;  %v699_v58 = vmul.f32 %v1243_v53, %v1227_v60  ;;  %v679_v59 = vadd.f32 %v678_v51, %v677_v46  ;;  %v646_v60 = vadd.f32 %v645_v6, %v644_v52 }
 0x1d1   : > { %v697_v62 = vmul.f32 %v1245_v25, %v1229_v30  ;;  %v686_v12 = vadd.f32 %v685_v11, %v684_v1 }
 0x1d2   : > { %717 = vperm.xlu1 %1199, %v699_v58   ;;  %v680_v63 = vrot.slane %v679_v59, 1 }
 0x1d3   : > { %707 = vperm.xlu0 %1198, %v697_v62   ;;  %v687_v15 = vrot.slane %v686_v12, 1 }
 0x1d4   : > { %v681_v2 = vadd.f32 %v680_v63, %v679_v59 }
 0x1d5   : > { %v688_v23 = vadd.f32 %v687_v15, %v686_v12 }
 0x1d6   : > { %1246 = vrcp.f32 %v681_v2 }
 0x1d7   : > { %1248 = vrcp.f32 %v667_v4 }
 0x1d8   : > { %1250 = vrcp.f32 %v660_v7 }
 0x1d9   : > { %1252 = vrcp.f32 %v646_v60 }
 0x1da   : > { %1254 = vrcp.f32 %v674_v3 }
 0x1db   : > { %1256 = vrcp.f32 %v688_v23 }
 0x1e0   : > { %v1247_v30 = vpop.eup %1246 }
 0x1e1   : > { %v703_v18 = vmul.f32 %v1247_v30, %v1239_v39  ;;  %v1249_v21 = vpop.eup %1248 }
 0x1e2   : > { %v701_v26 = vmul.f32 %v1249_v21, %v1555_v14  ;;  %v1251_v27 = vpop.eup %1250  ;;  %v833_v14 = vld [vmem:[%s1692_s4] sm:$0xff] }
 0x1e3   : > { %737 = vperm.xlu1 %1199, %v703_v18   ;;  %v700_v28 = vmul.f32 %v1251_v27, %v1553_v10  ;;  %v1253_v32 = vpop.eup %1252  ;;  %v834_v10 = vld [vmem:[%s1692_s4 + $0x8] sm:$0xff] }
 0x1e4   : > { %v698_v34 = vmul.f32 %v1253_v32, %v1559_v17  ;;  %v1255_v16 = vpop.eup %1254  ;;  %v1133_v5 = vpack.c.bf16 %v834_v10, %v833_v14  ;;  %v835_v17 = vld [vmem:[%s1692_s4 + $0x10] sm:$0xff] }
 0x1e5   : > { %v702_v37 = vmul.f32 %v1255_v16, %v1565_v35  ;;  %v1257_v38 = vpop.eup %1256  ;;  %v836_v35 = vld [vmem:[%s1692_s4 + $0x18] sm:$0xff] }
 0x1e6   : > { %v704_v39 = vmul.f32 %v1257_v38, %v1241_v42  ;;  %1134 = vmatpush3.bf16.msra.mxu1 %v1133_v5  ;;  %v1136_v41 = vpack.c.bf16 %v836_v35, %v835_v17 }
 0x1e7   : > { %727 = vperm.xlu1 %1199, %v701_v26   ;;  %1135 = vmatprep.subr.bf16.mxu1 %v1356_v40 }
 0x1ea   : > { %1137 = vmatpush3.bf16.msra.mxu1 %v1136_v41 }
 0x1eb   : > { %722 = vperm.xlu1 %1199, %v700_v28  }
 0x1ef   : > { %712 = vperm.xlu1 %1199, %v698_v34  }
 0x1f3   : > { %732 = vperm.xlu1 %1199, %v702_v37  }
 0x1f7   : > { %742 = vperm.xlu1 %1199, %v704_v39  }
 0x251   : > { %v718_v42 = vpop.permute.xlu1 %717 }
 0x252   : > { %v708_v8 = vpop.permute.xlu0 %707  ;;  %v747_v44 = vmul.f32 %v1475_v19, %v718_v42 }
 0x253   : > { %v745_v43 = vmul.f32 %v1477_v20, %v708_v8 }
 0x254   : > { %v767_v49 = vsel %vm463_vm1, %v747_v44, 0.0 }
 0x255   : > { %v753_v46 = vsel %vm463_vm1, %v745_v43, 0.0  ;;  %v768_v55 = vrot.slane %v767_v49, 4 }
 0x256   : > { %v754_v53 = vrot.slane %v753_v46, 4 }
 0x257   : > { %v769_v58 = vadd.f32 %v768_v55, %v767_v49 }
 0x258   : > { %v755_v57 = vadd.f32 %v754_v53, %v753_v46 }
 0x259   : > { %v770_v1 = vrot.slane %v769_v58, 2 }
 0x25b   : > { %v771_v13 = vadd.f32 %v770_v1, %v769_v58 }
 0x25d   : > { %v772_v32 = vrot.slane %v771_v13, 1 }
 0x262   : > { %v738_v45 = vpop.permute.xlu1 %737 }
 0x263   : > { %v751_v54 = vmul.f32 %v1499_v36, %v738_v45  ;;  %v756_v36 = vrot.slane %v755_v57, 2 }
 0x265   : > { %v795_v19 = vsel %vm463_vm1, %v751_v54, 0.0  ;;  %v757_v11 = vadd.f32 %v756_v36, %v755_v57 }
 0x266   : > { %v728_v50 = vpop.permute.xlu1 %727  ;;  %v796_v63 = vrot.slane %v795_v19, 4 }
 0x267   : > { %v749_v51 = vmul.f32 %v1489_v29, %v728_v50  ;;  %v758_v26 = vrot.slane %v757_v11, 1 }
 0x268   : > { %v797_v6 = vadd.f32 %v796_v63, %v795_v19 }
 0x269   : > { %v781_v48 = vsel %vm463_vm1, %v749_v51, 0.0  ;;  %v759_v10 = vadd.f32 %v758_v26, %v757_v11 }
 0x26a   : > { %v723_v56 = vpop.permute.xlu1 %722  ;;  %v782_v25 = vrot.slane %v781_v48, 4  ;;  %v798_v18 = vrot.slane %v797_v6, 2 }
 0x26b   : > { %v748_v20 = vmul.f32 %v1480_v22, %v723_v56 }
 0x26c   : > { %v783_v29 = vadd.f32 %v782_v25, %v781_v48  ;;  %v799_v39 = vadd.f32 %v798_v18, %v797_v6 }
 0x26d   : > { %v774_v59 = vsel %vm463_vm1, %v748_v20, 0.0 }
 0x26e   : > { %v775_v61 = vrot.slane %v774_v59, 4  ;;  %v713_v62 = vpop.permute.xlu1 %712  ;;  %v784_v7 = vrot.slane %v783_v29, 2  ;;  %v800_v43 = vrot.slane %v799_v39, 1 }
 0x26f   : > { %v746_v0 = vmul.f32 %v1483_v24, %v713_v62 }
 0x270   : > { %v776_v52 = vadd.f32 %v775_v61, %v774_v59  ;;  %v785_v21 = vadd.f32 %v784_v7, %v783_v29  ;;  %v801_v55 = vadd.f32 %v800_v43, %v799_v39 }
 0x271   : > { %v760_v2 = vsel %vm463_vm1, %v746_v0, 0.0 }
 0x272   : > { %v777_v4 = vrot.slane %v776_v52, 2  ;;  %v761_v47 = vrot.slane %v760_v2, 4  ;;  %v733_v22 = vpop.permute.xlu1 %732  ;;  %v786_v14 = vrot.slane %v785_v21, 1 }
 0x273   : > { %v750_v9 = vmul.f32 %v1492_v31, %v733_v22 }
 0x274   : > { %v762_v60 = vadd.f32 %v761_v47, %v760_v2  ;;  %v778_v30 = vadd.f32 %v777_v4, %v776_v52  ;;  %v787_v44 = vadd.f32 %v786_v14, %v785_v21 }
 0x275   : > { %v788_v12 = vsel %vm463_vm1, %v750_v9, 0.0 }
 0x276   : > { %v763_v3 = vrot.slane %v762_v60, 2  ;;  %v789_v24 = vrot.slane %v788_v12, 4  ;;  %v743_v15 = vpop.permute.xlu1 %742  ;;  %v779_v31 = vrot.slane %v778_v30, 1 }
 0x277   : > { %v752_v23 = vmul.f32 %v1495_v33, %v743_v15  ;;  %v773_v33 = vadd.f32 %v772_v32, %v771_v13 }
 0x278   : > { %v764_v27 = vadd.f32 %v763_v3, %v762_v60  ;;  %v790_v28 = vadd.f32 %v789_v24, %v788_v12  ;;  %v780_v35 = vadd.f32 %v779_v31, %v778_v30 }
 0x279   : > { %v802_v34 = vsel %vm463_vm1, %v752_v23, 0.0 }
 0x27a   : > { %v765_v16 = vrot.slane %v764_v27, 1  ;;  %v791_v37 = vrot.slane %v790_v28, 2  ;;  %v803_v38 = vrot.slane %v802_v34, 4 }
 0x27c   : > { %v766_v5 = vadd.f32 %v765_v16, %v764_v27  ;;  %v792_v40 = vadd.f32 %v791_v37, %v790_v28  ;;  %v804_v17 = vadd.f32 %v803_v38, %v802_v34 }
 0x27e   : > { %v818_v41 = vsel %vm817_vm12, %v766_v5, %v759_v10  ;;  %v793_v42 = vrot.slane %v792_v40, 1  ;;  %v805_v8 = vrot.slane %v804_v17, 2 }
 0x27f   : > { %v820_v45 = vsel %vm819_vm13, %v773_v33, %v818_v41 }
 0x280   : > { %v794_v46 = vadd.f32 %v793_v42, %v792_v40  ;;  %v806_v49 = vadd.f32 %v805_v8, %v804_v17  ;;  %v822_v50 = vsel %vm821_vm14, %v780_v35, %v820_v45 }
 0x281   : > { %v824_v51 = vsel %vm823_vm15, %v787_v44, %v822_v50 }
 0x282   : > { %v807_v53 = vrot.slane %v806_v49, 1  ;;  %v826_v54 = vsel %vm825_vm0, %v794_v46, %v824_v51 }
 0x283   : > { %v828_v56 = vsel %vm827_vm2, %v801_v55, %v826_v54 }
 0x284   : > { %v808_v48 = vadd.f32 %v807_v53, %v806_v49 }
 0x286   : > { %v830_v25 = vsel %vm829_vm3, %v808_v48, %v828_v56 }
 0x287   : > { %1130 = vmatmul.mubr.msk.f32.vlgmr.msra.gmra.mrb[4].mxu1 %vm463_vm1, %v830_v25  ;;  %832 = vst.msk [vmem:[%s265_s13] sm:$0xff] %vm463_vm1, %v830_v25 }
 0x288   : > { %1271 = shalt.err (!%p1268_p3)
}
 0x289   : > { %s1272_s29 = scalar_lea.hbm %s1618_s11, 128  ;;  %s1276_s16 = scalar_lea.hbm %s1693_s5, 256 }
 0x28a   : > { %p1273_p4 = scmp.ne.s32.totalorder %s1618_s11, %s1272_s29  ;;  %p1277_p9 = scmp.lt.u32.totalorder %s1618_s11, %s1693_s5 }
 0x28b   : > { %p1278_p10 = scmp.lt.u32.totalorder %s1276_s16, %s1272_s29  ;;  %p1280_p12 = scmp.lt.u32.totalorder %s1272_s29, %s1618_s11 }
 0x28c   : > { %p1274_p7 = pnand %p1273_p4, %p1433_p5 }
 0x28d   : > { %p1279_p11 = por %p1278_p10, %p1277_p9 }
 0x28e   : > { %p1275_p8 = pneg %p1274_p7 }
 0x28f   : > { %p1281_p13 = por %p1280_p12, %p1279_p11 }
 0x291   : > { %p1282_p0 = pnand %p1281_p13, %p1275_p8 }
 0x293   : > { %1285 = shalt.err (!%p1282_p0)
}
 0x294   : > { %1150 = dma.vmem_to_hbm [thread:$0]  (%p1433_p5), %s931_s15, 128, %s1618_s11, %s912_s18   ;;  %vm909_vm1 = vcmask 130048  }
 0x295   : > { %s272_s19 = scalar_lea.vmem [#allocation4], %s1050_s12  ;;  %s1645_s29 = scalar_lea.hbm %s1694_s6, %s1082_s14 }
 0x296   : > { %s943_s26 = sshll.u32 %s272_s19, 4  ;;  %s917_s13 = scalar_lea.sflag [#allocation5], %s1605_s10  ;;  %s1647_s26 = int_to_ptr.vmem [resolvable:$true] %s943_s26 }
 0x297   : > { %s1286_s15 = scalar_lea.vmem %s1647_s26, 128  ;;  %s1359_s25 = smov [#allocation4]  }
 0x298   : > { %p1287_p1 = scmp.ne.s32.totalorder %s1647_s26, %s1286_s15  ;;  %s1290_s12 = sshll.u32 %s1359_s25, 4  ;;  %s1291_s12 = int_to_ptr.vmem [resolvable:$false] %s1290_s12 }
 0x299   : > { %s1292_s11 = scalar_lea.vmem %s1291_s12, 256  ;;  %p1293_p4 = scmp.lt.s32.totalorder %s1647_s26, %s1291_s12 }
 0x29a   : > { %p1288_p2 = pnand %p1287_p1, %p1433_p5  ;;  %p1294_p7 = scmp.lt.s32.totalorder %s1292_s11, %s1286_s15 }
 0x29c   : > { %p1289_p3 = pneg %p1288_p2  ;;  %p1295_p8 = por %p1294_p7, %p1293_p4 }
 0x29e   : > { %p1296_p9 = pnand %p1295_p8, %p1289_p3 }
 0x35a   : > { %v905_v20 = vpop.f32.mrb[4].mxu1 }
 0x35b   : > { %910 = vst.msk [vmem:[%s272_s19] sm:$0xff] %vm909_vm1, %v905_v20  ;;  %v1131_v57 = vpop.f32.mrb[5].mxu1 }
 0x35c   : > { %1299 = shalt.err (!%p1296_p9)
}
 0x35d   : > { %s1300_s10 = scalar_lea.hbm %s1645_s29, 128  ;;  %s1304_s16 = scalar_lea.hbm %s1694_s6, 256 }
 0x35e   : > { %p1301_p10 = scmp.ne.s32.totalorder %s1645_s29, %s1300_s10  ;;  %p1305_p13 = scmp.lt.u32.totalorder %s1645_s29, %s1694_s6 }
 0x35f   : > { %p1306_p0 = scmp.lt.u32.totalorder %s1304_s16, %s1300_s10  ;;  %p1308_p2 = scmp.lt.u32.totalorder %s1300_s10, %s1645_s29 }
 0x360   : > { %p1302_p11 = pnand %p1301_p10, %p1433_p5 }
 0x361   : > { %p1307_p1 = por %p1306_p0, %p1305_p13 }
 0x362   : > { %p1303_p12 = pneg %p1302_p11 }
 0x363   : > { %p1309_p3 = por %p1308_p2, %p1307_p1 }
 0x365   : > { %p1310_p4 = pnand %p1309_p3, %p1303_p12 }
 0x367   : > { %1313 = shalt.err (!%p1310_p4)
}
 0x368   : > { %1151 = dma.vmem_to_hbm [thread:$0]  (%p1433_p5), %s1647_s26, 128, %s1645_s29, %s917_s13  }
 0x369 PF: > { %p1161_p7 = scmp.ge.s32.totalorder %s1352_s24, 2  ;;  %s955_s19 = sand.u32 1, %s1340_s21  }
 0x36a   : > { %s956_s28 = scalar_lea.sflag [#allocation3], %s955_s19 }
 0x36b   : > { %p1155_p8 = pnand %p1161_p7, %p1437_p6 }
 0x36d   : > { %1331 = dma.done.wait (!%p1155_p8), %s956_s28, 128  }
 0x36e   : > { %1333 = vsyncadd (!%p1155_p8), %s956_s28, 4294967168  ;;  %s965_s9 = scalar_lea.sflag [#allocation5], %s955_s19 }
 0x36f   : > { %1335 = dma.done.wait (!%p1155_p8), %s965_s9, 128  }
 0x370   : > { %1337 = vsyncadd (!%p1155_p8), %s965_s9, 4294967168  ;;  %p20_p5 = scmp.ge.s32.totalorder %s1420_s27, 4   ;;  %s1697_s21 = smov %s1344_s22 }
 0x371   : > { %s1698_s22 = smov %s1348_s23  ;;  %s1699_s23 = smov %s1431_s30 }
 0x372   : > { %s1700_s24 = smov %s1420_s27  ;;  %22 = sbr.rel (!%p20_p5) target bundleno = 5 (0x5), region = 95 }
 0x379   :  { %970 = vsyncpa [#allocation3], 1 }
 0x37a   :  { %972 = vsyncpa [#allocation3 + $0x1], 1 }
 0x37b   :  { %973 = vsyncpa [#allocation5], 1 }
 0x37c   :  { %975 = vsyncpa [#allocation5 + $0x1], 1 }

</bundles_post_ra>
